<compile_context>
chip_gen: v7x
topology: tpu7x:2x2x1
jax: 0.10.0
libtpu: 0.0.40
codegen_flags: <defaults>
</compile_context>

<pallas_src>
import math
import jax
import jax.numpy as jnp
from jax import lax
from jax.experimental import pallas as pl
from jax.experimental.pallas import tpu as pltpu

# ---- small synthetic config (module defaults are D=768, Heads=12, S~197) ----
D = 32          # hidden size
HEADS = 4       # number of heads
HEAD_DIM = D // HEADS
BATCH = 2
SEQ = 8

assert D % HEADS == 0

# Safe on v5e/v6e/v7x; at real module sizes this budget still fits (see above),
# but re-derive if tiles are grown (v7x has only 64 MiB physical VMEM).
VMEM_LIMIT_BYTES = 32 * 1024 * 1024


# ---------------------------------------------------------------------------
# Fused MSA kernel: one grid step = one batch element.
#   x_ref    : (S, D)     input slab for this batch element
#   wqkv_ref : (D, 3D)    fused [Wq|Wk|Wv], VMEM-resident across the grid
#   bqkv_ref : (1, 3D)    fused [bq|bk|bv]
#   wo_ref   : (D, D)     output projection weight, resident
#   bo_ref   : (1, D)     output projection bias
#   out_ref  : (S, D)     lane-dense output slab
#   heads_ref: (S, D)     VMEM scratch holding the merged-head attention output
# ---------------------------------------------------------------------------
def msa_kernel(x_ref, wqkv_ref, bqkv_ref, wo_ref, bo_ref, out_ref, heads_ref):
    # Fused Q/K/V projection: one wide MXU matmul, x read once.
    qkv = (
        jnp.dot(x_ref[...], wqkv_ref[...], preferred_element_type=jnp.float32)
        + bqkv_ref[...]
    )  # (S, 3D)

    scale = 1.0 / math.sqrt(D)  # full embed dim, matching the PyTorch module
    for h in range(HEADS):      # static unroll over heads
        lo = h * HEAD_DIM
        hi = lo + HEAD_DIM
        q = qkv[:, lo:hi] * scale                   # fold scale into q (S*dh)
        k = qkv[:, D + lo:D + hi]                   # (S, dh)
        v = qkv[:, 2 * D + lo:2 * D + hi]           # (S, dh)

        # scores = (q*scale) @ k^T  (contract last dims directly; no .T)
        s = lax.dot_general(
            q, k,
            dimension_numbers=(((1,), (1,)), ((), ())),
            preferred_element_type=jnp.float32,
        )                                            # (S, S)

        s = s - jnp.max(s, axis=-1, keepdims=True)
        p = jnp.exp(s)
        p = p * pl.reciprocal(jnp.sum(p, axis=-1, keepdims=True), approx=True)
        # TODO(synk): train-mode attention dropout (p=0.1) not implemented
        #             (would use pltpu.prng_seed / pltpu.prng_random_bits).

        heads_ref[:, lo:hi] = jnp.dot(
            p, v, preferred_element_type=jnp.float32
        )                                            # (S, dh)

    # Output projection on the merged heads, still in VMEM.
    out_ref[...] = (
        jnp.dot(heads_ref[...], wo_ref[...], preferred_element_type=jnp.float32)
        + bo_ref[...]
    ).astype(out_ref.dtype)


# ---------------------------------------------------------------------------
# MSA forward
# ---------------------------------------------------------------------------
def msa_forward(x, params):
    B, S, E = x.shape

    # Fuse Q/K/V weights -> one (D, 3D) resident weight, one pass over x.
    w_qkv = jnp.concatenate([params["wq"], params["wk"], params["wv"]], axis=1)
    b_qkv = jnp.concatenate(
        [params["bq"], params["bk"], params["bv"]], axis=0
    ).reshape(1, 3 * E)
    bo = params["bo"].reshape(1, E)

    return pl.pallas_call(
        msa_kernel,
        out_shape=jax.ShapeDtypeStruct((B, S, E), jnp.float32),
        grid_spec=pltpu.PrefetchScalarGridSpec(
            num_scalar_prefetch=0,
            grid=(B,),
            in_specs=[
                # per-batch x slab (pipelined / double-buffered)
                pl.BlockSpec((pl.Squeezed(), S, E), lambda b: (b, 0, 0)),
                # weights / biases: constant index_map -> fetched once, resident
                pl.BlockSpec((E, 3 * E), lambda b: (0, 0)),
                pl.BlockSpec((1, 3 * E), lambda b: (0, 0)),
                pl.BlockSpec((E, E), lambda b: (0, 0)),
                pl.BlockSpec((1, E), lambda b: (0, 0)),
            ],
            out_specs=pl.BlockSpec((pl.Squeezed(), S, E), lambda b: (b, 0, 0)),
            scratch_shapes=[pltpu.VMEM((S, E), jnp.float32)],
        ),
        compiler_params=pltpu.CompilerParams(
            dimension_semantics=("parallel",),
            vmem_limit_bytes=VMEM_LIMIT_BYTES,
        ),
    )(x, w_qkv, b_qkv, params["wo"], bo)


# ---------------------------------------------------------------------------
# deterministic parameter init (PyTorch nn.Linear-style uniform bounds)
# ---------------------------------------------------------------------------
def init_params(key):
    bound = 1.0 / math.sqrt(D)
    keys = jax.random.split(key, 8)
    u = lambda k, shape: jax.random.uniform(
        k, shape, jnp.float32, minval=-bound, maxval=bound
    )
    return {
        "wq": u(keys[0], (D, D)), "bq": u(keys[1], (D,)),
        "wk": u(keys[2], (D, D)), "bk": u(keys[3], (D,)),
        "wv": u(keys[4], (D, D)), "bv": u(keys[5], (D,)),
        "wo": u(keys[6], (D, D)), "bo": u(keys[7], (D,)),
    }


# ---------------------------------------------------------------------------
# pure-JAX reference (eval-mode dropout) for a correctness sanity check
# ---------------------------------------------------------------------------
def msa_reference(x, p):
    B, S, E = x.shape
    q = x @ p["wq"] + p["bq"]
    k = x @ p["wk"] + p["bk"]
    v = x @ p["wv"] + p["bv"]

    def sh(t):
        return t.reshape(B, S, HEADS, HEAD_DIM).transpose(0, 2, 1, 3)

    qh, kh, vh = sh(q), sh(k), sh(v)
    att = jnp.einsum("bhqd,bhkd->bhqk", qh, kh) / math.sqrt(D)
    att = jax.nn.softmax(att, axis=-1)
    o = jnp.einsum("bhqk,bhkd->bhqd", att, vh)
    o = o.transpose(0, 2, 1, 3).reshape(B, S, E)
    return o @ p["wo"] + p["bo"]


if __name__ == "__main__":
    key = jax.random.PRNGKey(0)
    k_x, k_p = jax.random.split(key)
    x = jax.random.normal(k_x, (BATCH, SEQ, D), dtype=jnp.float32)
    params = init_params(k_p)

    out = jax.jit(msa_forward)(x, params)
    out = jax.block_until_ready(out)

    ref = msa_reference(x, params)
    assert out.shape == (BATCH, SEQ, D)
    # tolerance accommodates pl.reciprocal(approx=True) in the softmax denom
    assert jnp.allclose(out, ref, atol=5e-3, rtol=5e-3), (
        f"mismatch vs reference (max abs err {jnp.max(jnp.abs(out - ref))})"
    )

    print("KERNEL_OK")
</pallas_src>

<mosaic_0001>
module attributes {stable_mosaic.version = 11 : i64} {
  func.func @msa_kernel(%arg0: i32, %arg1: memref<1x8x32xf32, #tpu.memory_space<vmem>>, %arg2: memref<32x96xf32, #tpu.memory_space<vmem>>, %arg3: memref<1x96xf32, #tpu.memory_space<vmem>>, %arg4: memref<32x32xf32, #tpu.memory_space<vmem>>, %arg5: memref<1x32xf32, #tpu.memory_space<vmem>>, %arg6: memref<1x8x32xf32, #tpu.memory_space<vmem>>, %arg7: memref<8x32xf32, #tpu.memory_space<vmem>>) attributes {dimension_semantics = [#tpu.dimension_semantics<parallel>], iteration_bounds = array<i64: 2>, scalar_prefetch = 0 : i64, scratch_operands = 1 : i64, tpu.core_type = #tpu.core_type<tc>, window_params = [{transform_indices = @transform_0, window_bounds = array<i64: 1, 8, 32>}, {pipeline_mode = #tpu.pipeline_mode<synchronous>, transform_indices = @transform_1, window_bounds = array<i64: 32, 96>}, {pipeline_mode = #tpu.pipeline_mode<synchronous>, transform_indices = @transform_2, window_bounds = array<i64: 1, 96>}, {pipeline_mode = #tpu.pipeline_mode<synchronous>, transform_indices = @transform_3, window_bounds = array<i64: 32, 32>}, {pipeline_mode = #tpu.pipeline_mode<synchronous>, transform_indices = @transform_4, window_bounds = array<i64: 1, 32>}, {transform_indices = @transform_5, window_bounds = array<i64: 1, 8, 32>}]} {
    %c0 = arith.constant 0 : index
    %c0_0 = arith.constant 0 : index
    %c0_1 = arith.constant 0 : index
    %0 = vector.load %arg1[%c0, %c0_0, %c0_1] : memref<1x8x32xf32, #tpu.memory_space<vmem>>, vector<1x8x32xf32>
    %1 = vector.shape_cast %0 : vector<1x8x32xf32> to vector<8x32xf32>
    %c0_2 = arith.constant 0 : index
    %c0_3 = arith.constant 0 : index
    %2 = vector.load %arg2[%c0_2, %c0_3] : memref<32x96xf32, #tpu.memory_space<vmem>>, vector<32x96xf32>
    %cst = arith.constant dense<0.000000e+00> : vector<8x96xf32>
    %3 = tpu.matmul %1, %2, %cst {dimension_numbers = #tpu.dot_dimension_numbers<[1], [0], [0], [1], [0, 0, 1, 1], [], []>} : vector<8x32xf32>, vector<32x96xf32>, vector<8x96xf32> -> vector<8x96xf32>
    %c0_4 = arith.constant 0 : index
    %c0_5 = arith.constant 0 : index
    %4 = vector.load %arg3[%c0_4, %c0_5] : memref<1x96xf32, #tpu.memory_space<vmem>>, vector<1x96xf32>
    %5 = vector.broadcast %4 : vector<1x96xf32> to vector<8x96xf32>
    %6 = arith.addf %3, %5 : vector<8x96xf32>
    %7 = vector.extract_strided_slice %6 {offsets = [0, 0], sizes = [8, 8], strides = [1, 1]} : vector<8x96xf32> to vector<8x8xf32>
    %cst_6 = arith.constant 0.176776692 : f32
    %8 = vector.broadcast %cst_6 : f32 to vector<8x8xf32>
    %9 = arith.mulf %7, %8 : vector<8x8xf32>
    %10 = vector.extract_strided_slice %6 {offsets = [0, 32], sizes = [8, 8], strides = [1, 1]} : vector<8x96xf32> to vector<8x8xf32>
    %11 = vector.extract_strided_slice %6 {offsets = [0, 64], sizes = [8, 8], strides = [1, 1]} : vector<8x96xf32> to vector<8x8xf32>
    %cst_7 = arith.constant dense<0.000000e+00> : vector<8x8xf32>
    %12 = tpu.matmul %9, %10, %cst_7 {dimension_numbers = #tpu.dot_dimension_numbers<[1], [1], [0], [0], [0, 0, 1, 0], [], []>} : vector<8x8xf32>, vector<8x8xf32>, vector<8x8xf32> -> vector<8x8xf32>
    %cst_8 = arith.constant dense<0xFF800000> : vector<8xf32>
    %13 = vector.multi_reduction <maximumf>, %12, %cst_8 [1] : vector<8x8xf32> to vector<8xf32>
    %14 = vector.shape_cast %13 : vector<8xf32> to vector<8x1xf32>
    %15 = vector.broadcast %14 : vector<8x1xf32> to vector<8x8xf32>
    %16 = arith.subf %12, %15 : vector<8x8xf32>
    %17 = math.exp %16 : vector<8x8xf32>
    %cst_9 = arith.constant dense<0.000000e+00> : vector<8xf32>
    %18 = vector.multi_reduction <add>, %17, %cst_9 [1] : vector<8x8xf32> to vector<8xf32>
    %19 = vector.shape_cast %18 : vector<8xf32> to vector<8x1xf32>
    %20 = tpu.reciprocal %19 {approx = true} : vector<8x1xf32> -> vector<8x1xf32>
    %21 = vector.broadcast %20 : vector<8x1xf32> to vector<8x8xf32>
    %22 = arith.mulf %17, %21 : vector<8x8xf32>
    %cst_10 = arith.constant dense<0.000000e+00> : vector<8x8xf32>
    %23 = tpu.matmul %22, %11, %cst_10 {dimension_numbers = #tpu.dot_dimension_numbers<[1], [0], [0], [1], [0, 0, 1, 1], [], []>} : vector<8x8xf32>, vector<8x8xf32>, vector<8x8xf32> -> vector<8x8xf32>
    %c0_11 = arith.constant 0 : index
    %c0_12 = arith.constant 0 : index
    %24 = vector.load %arg7[%c0_11, %c0_12] : memref<8x32xf32, #tpu.memory_space<vmem>>, vector<8x8xf32>
    tpu.vector_store %arg7[%c0_11, %c0_12], %23 {strides = array<i32>} : memref<8x32xf32, #tpu.memory_space<vmem>>, vector<8x8xf32>,
    %25 = vector.extract_strided_slice %6 {offsets = [0, 8], sizes = [8, 8], strides = [1, 1]} : vector<8x96xf32> to vector<8x8xf32>
    %cst_13 = arith.constant 0.176776692 : f32
    %26 = vector.broadcast %cst_13 : f32 to vector<8x8xf32>
    %27 = arith.mulf %25, %26 : vector<8x8xf32>
    %28 = vector.extract_strided_slice %6 {offsets = [0, 40], sizes = [8, 8], strides = [1, 1]} : vector<8x96xf32> to vector<8x8xf32>
    %29 = vector.extract_strided_slice %6 {offsets = [0, 72], sizes = [8, 8], strides = [1, 1]} : vector<8x96xf32> to vector<8x8xf32>
    %cst_14 = arith.constant dense<0.000000e+00> : vector<8x8xf32>
    %30 = tpu.matmul %27, %28, %cst_14 {dimension_numbers = #tpu.dot_dimension_numbers<[1], [1], [0], [0], [0, 0, 1, 0], [], []>} : vector<8x8xf32>, vector<8x8xf32>, vector<8x8xf32> -> vector<8x8xf32>
    %cst_15 = arith.constant dense<0xFF800000> : vector<8xf32>
    %31 = vector.multi_reduction <maximumf>, %30, %cst_15 [1] : vector<8x8xf32> to vector<8xf32>
    %32 = vector.shape_cast %31 : vector<8xf32> to vector<8x1xf32>
    %33 = vector.broadcast %32 : vector<8x1xf32> to vector<8x8xf32>
    %34 = arith.subf %30, %33 : vector<8x8xf32>
    %35 = math.exp %34 : vector<8x8xf32>
    %cst_16 = arith.constant dense<0.000000e+00> : vector<8xf32>
    %36 = vector.multi_reduction <add>, %35, %cst_16 [1] : vector<8x8xf32> to vector<8xf32>
    %37 = vector.shape_cast %36 : vector<8xf32> to vector<8x1xf32>
    %38 = tpu.reciprocal %37 {approx = true} : vector<8x1xf32> -> vector<8x1xf32>
    %39 = vector.broadcast %38 : vector<8x1xf32> to vector<8x8xf32>
    %40 = arith.mulf %35, %39 : vector<8x8xf32>
    %cst_17 = arith.constant dense<0.000000e+00> : vector<8x8xf32>
    %41 = tpu.matmul %40, %29, %cst_17 {dimension_numbers = #tpu.dot_dimension_numbers<[1], [0], [0], [1], [0, 0, 1, 1], [], []>} : vector<8x8xf32>, vector<8x8xf32>, vector<8x8xf32> -> vector<8x8xf32>
    %c0_18 = arith.constant 0 : index
    %c8 = arith.constant 8 : index
    %42 = vector.load %arg7[%c0_18, %c8] : memref<8x32xf32, #tpu.memory_space<vmem>>, vector<8x8xf32>
    tpu.vector_store %arg7[%c0_18, %c8], %41 {strides = array<i32>} : memref<8x32xf32, #tpu.memory_space<vmem>>, vector<8x8xf32>,
    %43 = vector.extract_strided_slice %6 {offsets = [0, 16], sizes = [8, 8], strides = [1, 1]} : vector<8x96xf32> to vector<8x8xf32>
    %cst_19 = arith.constant 0.176776692 : f32
    %44 = vector.broadcast %cst_19 : f32 to vector<8x8xf32>
    %45 = arith.mulf %43, %44 : vector<8x8xf32>
    %46 = vector.extract_strided_slice %6 {offsets = [0, 48], sizes = [8, 8], strides = [1, 1]} : vector<8x96xf32> to vector<8x8xf32>
    %47 = vector.extract_strided_slice %6 {offsets = [0, 80], sizes = [8, 8], strides = [1, 1]} : vector<8x96xf32> to vector<8x8xf32>
    %cst_20 = arith.constant dense<0.000000e+00> : vector<8x8xf32>
    %48 = tpu.matmul %45, %46, %cst_20 {dimension_numbers = #tpu.dot_dimension_numbers<[1], [1], [0], [0], [0, 0, 1, 0], [], []>} : vector<8x8xf32>, vector<8x8xf32>, vector<8x8xf32> -> vector<8x8xf32>
    %cst_21 = arith.constant dense<0xFF800000> : vector<8xf32>
    %49 = vector.multi_reduction <maximumf>, %48, %cst_21 [1] : vector<8x8xf32> to vector<8xf32>
    %50 = vector.shape_cast %49 : vector<8xf32> to vector<8x1xf32>
    %51 = vector.broadcast %50 : vector<8x1xf32> to vector<8x8xf32>
    %52 = arith.subf %48, %51 : vector<8x8xf32>
    %53 = math.exp %52 : vector<8x8xf32>
    %cst_22 = arith.constant dense<0.000000e+00> : vector<8xf32>
    %54 = vector.multi_reduction <add>, %53, %cst_22 [1] : vector<8x8xf32> to vector<8xf32>
    %55 = vector.shape_cast %54 : vector<8xf32> to vector<8x1xf32>
    %56 = tpu.reciprocal %55 {approx = true} : vector<8x1xf32> -> vector<8x1xf32>
    %57 = vector.broadcast %56 : vector<8x1xf32> to vector<8x8xf32>
    %58 = arith.mulf %53, %57 : vector<8x8xf32>
    %cst_23 = arith.constant dense<0.000000e+00> : vector<8x8xf32>
    %59 = tpu.matmul %58, %47, %cst_23 {dimension_numbers = #tpu.dot_dimension_numbers<[1], [0], [0], [1], [0, 0, 1, 1], [], []>} : vector<8x8xf32>, vector<8x8xf32>, vector<8x8xf32> -> vector<8x8xf32>
    %c0_24 = arith.constant 0 : index
    %c16 = arith.constant 16 : index
    %60 = vector.load %arg7[%c0_24, %c16] : memref<8x32xf32, #tpu.memory_space<vmem>>, vector<8x8xf32>
    tpu.vector_store %arg7[%c0_24, %c16], %59 {strides = array<i32>} : memref<8x32xf32, #tpu.memory_space<vmem>>, vector<8x8xf32>,
    %61 = vector.extract_strided_slice %6 {offsets = [0, 24], sizes = [8, 8], strides = [1, 1]} : vector<8x96xf32> to vector<8x8xf32>
    %cst_25 = arith.constant 0.176776692 : f32
    %62 = vector.broadcast %cst_25 : f32 to vector<8x8xf32>
    %63 = arith.mulf %61, %62 : vector<8x8xf32>
    %64 = vector.extract_strided_slice %6 {offsets = [0, 56], sizes = [8, 8], strides = [1, 1]} : vector<8x96xf32> to vector<8x8xf32>
    %65 = vector.extract_strided_slice %6 {offsets = [0, 88], sizes = [8, 8], strides = [1, 1]} : vector<8x96xf32> to vector<8x8xf32>
    %cst_26 = arith.constant dense<0.000000e+00> : vector<8x8xf32>
    %66 = tpu.matmul %63, %64, %cst_26 {dimension_numbers = #tpu.dot_dimension_numbers<[1], [1], [0], [0], [0, 0, 1, 0], [], []>} : vector<8x8xf32>, vector<8x8xf32>, vector<8x8xf32> -> vector<8x8xf32>
    %cst_27 = arith.constant dense<0xFF800000> : vector<8xf32>
    %67 = vector.multi_reduction <maximumf>, %66, %cst_27 [1] : vector<8x8xf32> to vector<8xf32>
    %68 = vector.shape_cast %67 : vector<8xf32> to vector<8x1xf32>
    %69 = vector.broadcast %68 : vector<8x1xf32> to vector<8x8xf32>
    %70 = arith.subf %66, %69 : vector<8x8xf32>
    %71 = math.exp %70 : vector<8x8xf32>
    %cst_28 = arith.constant dense<0.000000e+00> : vector<8xf32>
    %72 = vector.multi_reduction <add>, %71, %cst_28 [1] : vector<8x8xf32> to vector<8xf32>
    %73 = vector.shape_cast %72 : vector<8xf32> to vector<8x1xf32>
    %74 = tpu.reciprocal %73 {approx = true} : vector<8x1xf32> -> vector<8x1xf32>
    %75 = vector.broadcast %74 : vector<8x1xf32> to vector<8x8xf32>
    %76 = arith.mulf %71, %75 : vector<8x8xf32>
    %cst_29 = arith.constant dense<0.000000e+00> : vector<8x8xf32>
    %77 = tpu.matmul %76, %65, %cst_29 {dimension_numbers = #tpu.dot_dimension_numbers<[1], [0], [0], [1], [0, 0, 1, 1], [], []>} : vector<8x8xf32>, vector<8x8xf32>, vector<8x8xf32> -> vector<8x8xf32>
    %c0_30 = arith.constant 0 : index
    %c24 = arith.constant 24 : index
    %78 = vector.load %arg7[%c0_30, %c24] : memref<8x32xf32, #tpu.memory_space<vmem>>, vector<8x8xf32>
    tpu.vector_store %arg7[%c0_30, %c24], %77 {strides = array<i32>} : memref<8x32xf32, #tpu.memory_space<vmem>>, vector<8x8xf32>,
    %c0_31 = arith.constant 0 : index
    %c0_32 = arith.constant 0 : index
    %79 = vector.load %arg7[%c0_31, %c0_32] : memref<8x32xf32, #tpu.memory_space<vmem>>, vector<8x32xf32>
    %c0_33 = arith.constant 0 : index
    %c0_34 = arith.constant 0 : index
    %80 = vector.load %arg4[%c0_33, %c0_34] : memref<32x32xf32, #tpu.memory_space<vmem>>, vector<32x32xf32>
    %cst_35 = arith.constant dense<0.000000e+00> : vector<8x32xf32>
    %81 = tpu.matmul %79, %80, %cst_35 {dimension_numbers = #tpu.dot_dimension_numbers<[1], [0], [0], [1], [0, 0, 1, 1], [], []>} : vector<8x32xf32>, vector<32x32xf32>, vector<8x32xf32> -> vector<8x32xf32>
    %c0_36 = arith.constant 0 : index
    %c0_37 = arith.constant 0 : index
    %82 = vector.load %arg5[%c0_36, %c0_37] : memref<1x32xf32, #tpu.memory_space<vmem>>, vector<1x32xf32>
    %83 = vector.broadcast %82 : vector<1x32xf32> to vector<8x32xf32>
    %84 = arith.addf %81, %83 : vector<8x32xf32>
    %c0_38 = arith.constant 0 : index
    %c0_39 = arith.constant 0 : index
    %c0_40 = arith.constant 0 : index
    %85 = vector.load %arg6[%c0_38, %c0_39, %c0_40] : memref<1x8x32xf32, #tpu.memory_space<vmem>>, vector<1x8x32xf32>
    %86 = vector.shape_cast %85 : vector<1x8x32xf32> to vector<8x32xf32>
    %87 = vector.shape_cast %84 : vector<8x32xf32> to vector<1x8x32xf32>
    tpu.vector_store %arg6[%c0_38, %c0_39, %c0_40], %87 {strides = array<i32>} : memref<1x8x32xf32, #tpu.memory_space<vmem>>, vector<1x8x32xf32>,
    return
  }
  func.func @transform_0(%arg0: i32) -> (i32, i32, i32) {
    %c0_i32 = arith.constant 0 : i32
    %c0_i32_0 = arith.constant 0 : i32
    %c0_i32_1 = arith.constant 0 : i32
    return %arg0, %c0_i32, %c0_i32_0 : i32, i32, i32
  }
  func.func @transform_1(%arg0: i32) -> (i32, i32) {
    %c0_i32 = arith.constant 0 : i32
    %c0_i32_0 = arith.constant 0 : i32
    %c0_i32_1 = arith.constant 0 : i32
    return %c0_i32, %c0_i32_0 : i32, i32
  }
  func.func @transform_2(%arg0: i32) -> (i32, i32) {
    %c0_i32 = arith.constant 0 : i32
    %c0_i32_0 = arith.constant 0 : i32
    %c0_i32_1 = arith.constant 0 : i32
    return %c0_i32, %c0_i32_0 : i32, i32
  }
  func.func @transform_3(%arg0: i32) -> (i32, i32) {
    %c0_i32 = arith.constant 0 : i32
    %c0_i32_0 = arith.constant 0 : i32
    %c0_i32_1 = arith.constant 0 : i32
    return %c0_i32, %c0_i32_0 : i32, i32
  }
  func.func @transform_4(%arg0: i32) -> (i32, i32) {
    %c0_i32 = arith.constant 0 : i32
    %c0_i32_0 = arith.constant 0 : i32
    %c0_i32_1 = arith.constant 0 : i32
    return %c0_i32, %c0_i32_0 : i32, i32
  }
  func.func @transform_5(%arg0: i32) -> (i32, i32, i32) {
    %c0_i32 = arith.constant 0 : i32
    %c0_i32_0 = arith.constant 0 : i32
    %c0_i32_1 = arith.constant 0 : i32
    return %arg0, %c0_i32, %c0_i32_0 : i32, i32, i32
  }
}

</mosaic_0001>

<bundles_post_ra>
// kernel: msa_forward.1
= control target key start
LH: loop header
LB: loop body
LE: loop exit
PB: predicated region body
PF: predicated region fallthrough
CT: control target
= control target key end

     0   :  { %10 = vsyncpa [#allocation4], 0  ;;  %s1653_s0 = inlined_call_operand.vmem [shape: f32[2,8,32], index: 0, kind: input, shape index: {}]   ;;  %s1654_s1 = inlined_call_operand.vmem [shape: f32[32,96], index: 1, kind: input, shape index: {}]   ;;  %s1655_s2 = inlined_call_operand.vmem [shape: f32[1,96], index: 2, kind: input, shape index: {}]   ;;  %s1656_s3 = inlined_call_operand.vmem [shape: f32[32,32], index: 3, kind: input, shape index: {}]   ;;  %s1657_s4 = inlined_call_operand.vmem [shape: f32[1,32], index: 4, kind: input, shape index: {}]   ;;  %s1658_s5 = inlined_call_operand.hbm [shape: f32[2,8,32], index: 5, kind: output, shape index: {}]  }
   0x1   :  { %12 = vsyncpa [#allocation4 + $0x1], 0  ;;  %s1456_s18 = smov 0   ;;  %s1458_s19 = smov 0  }
   0x2   :  { %s1460_s20 = smov 0   ;;  %s1462_s21 = smov 0  }
   0x3 LB: > { %s1477_s22 = sadd.s32 4294967295, %s1406_s21   ;;  %s1146_s23 = sadd.s32 4294967294, %s1406_s21   ;;  %s1406_s21 = sphi %s1462_s21, %s1664_s21   ;;  %s1402_s20 = sphi %s1460_s20, %s1663_s20   ;;  %s1398_s19 = sphi %s1458_s19, %s1662_s19   ;;  %s1394_s18 = sphi %s1456_s18, %s1661_s18  }
   0x4   : > { %s1481_s24 = sadd.s32 1, %s1406_s21   ;;  %s135_s25 = sadd.s32 1, %s1402_s20 }
   0x5   : > { %s132_s26 = ssub.s32 %s1406_s21, %s1481_s24  ;;  %p145_p0 = scmp.ne.s32.totalorder %s1402_s20, %s1398_s19 }
   0x6   : > { %p133_p1 = scmp.eq.s32.totalorder %s132_s26, 0  ;;  %p146_p2 = scmp.eq.s32.totalorder %s1477_s22, 1 }
   0x7   : > { %p151_p3 = scmp.ne.s32.totalorder %s1398_s19, %s1394_s18  ;;  %p152_p4 = scmp.eq.s32.totalorder %s1146_s23, 1 }
   0x8   : > { %s1492_s27 = scalar_select %p133_p1, %s1402_s20, %s135_s25  }
   0x9   : > { %p1494_p5 = por %p146_p2, %p145_p0  ;;  %p1498_p6 = por %p152_p4, %p151_p3 }
   0xa   : > { %p1149_p7 = scmp.ge.s32.totalorder %s1406_s21, 1  ;;  %p189_p8 = scmp.lt.s32.totalorder %s1406_s21, 3 }
   0xc   : > { %p190_p9 = pnand %p1149_p7, %p189_p8 }
   0xd   : > { %v221_v0 = vld [vmem:[%s1654_s1] sm:$0xff] (!%p190_p9)  ;;  %v222_v1 = vld [vmem:[%s1654_s1 + $0x8] sm:$0xff] (!%p190_p9)  ;;  %v223_v2 = vld [vmem:[%s1654_s1 + $0x10] sm:$0xff] (!%p190_p9)  ;;  %v1408_v3 = vmov (!%p190_p9), 0.0|0.0   ;;  %vm1409_vm0 = vmmov (!%p190_p9), 0   ;;  %v1410_v6 = vmov (!%p190_p9), 0.0  }
   0xe   : > { %193 = sbr.rel (%p190_p9) target bundleno = 2025 (0x7e9), region = 40  ;;  %1260 = vmatprep.subr.bf16.mxu0 (!%p190_p9), %v1408_v3  ;;  %v1261_v4 = vpack.c.bf16 (!%p190_p9), %v222_v1, %v221_v0  ;;  %v224_v5 = vld [vmem:[%s1654_s1 + $0x18] sm:$0xff] (!%p190_p9)  ;;  %1206 = vmatprep.mubr.msk.f32.mxu0 (!%p190_p9), %vm1409_vm0, %v1410_v6  ;;  %p216_p10 = scmp.lt.s32.totalorder (!%p190_p9), %s1477_s22, 1  ;;  %vm232_vm1 = vcmask (!%p190_p9), 261120   ;;  %v1152_v9 = vld [vmem:[%s1655_s2] ss:$0 sm:$0xff] (!%p190_p9) }
   0xf   : > { %1209 = vmatprep.subr.mxu1 (!%p190_p9), %v1410_v6  ;;  %1211 = vmatprep.mubr.msk.f32.mxu1 (!%p190_p9), %vm1409_vm0, %v1410_v6  ;;  %v1264_v7 = vpack.c.bf16 (!%p190_p9), %v224_v5, %v223_v2  ;;  %s1411_s26 = smov (!%p190_p9), 64   ;;  %s1412_s30 = smov (!%p190_p9), 96   ;;  %vm310_vm2 = vcmask (!%p190_p9), 64512   ;;  %vm643_vm3 = vcmask (!%p190_p9), 130112   ;;  %vm814_vm4 = vcmask (!%p190_p9), 195712  }
  0x10   : > { %1262 = vmatpush3.bf16.msra.mxu0 (!%p190_p9), %v1261_v4  ;;  %s1413_s6 = smov (!%p190_p9), 88   ;;  %s1414_s7 = smov (!%p190_p9), 120   ;;  %vm985_vm5 = vcmask (!%p190_p9), 261312  }
  0x11   : > { %1263 = vmatprep.subr.bf16.mxu0 (!%p190_p9), %v1408_v3  ;;  %s1415_s8 = smov (!%p190_p9), 80   ;;  %s1416_s9 = smov (!%p190_p9), 72  }
  0x12   : > { %s1417_s10 = smov (!%p190_p9), 112   ;;  %s1418_s11 = smov (!%p190_p9), 104  }
  0x13   : > { %s1419_s12 = smov (!%p190_p9), 56  }
  0x14   : > { %1265 = vmatpush3.bf16.msra.mxu0 (!%p190_p9), %v1264_v7 }
  0x15   : > { %s217_s13 = scalar_select %p216_p10, %s1477_s22, 1  ;;  %1229 = vmatprep.subr.mxu0 %v1410_v6 }
  0x17   : > { %s1151_s14 = sshll.u32 %s217_s13, 3  ;;  %s1420_s13 = smov 48  }
  0x18   : > { %s219_s17 = scalar_lea.vmem %s1653_s0, %s1151_s14  ;;  %s1421_s14 = smov 40  }
  0x19   : > { %v220_v8 = vld [vmem:[%s219_s17] sm:$0xff] }
  0x1a   : > { %1207 = vmatmul.mubr.msk.f32.vlgmr.msra.gmra.mrb[0].mxu0 %vm232_vm1, %v220_v8 }
  0x1b   : > { %1231 = vmatprep.mubr.msk.f32.mxu0 %vm1409_vm0, %v1410_v6 }
  0xed   : > { %v302_v10 = vpop.f32.mrb[0].mxu0 }
  0xee   : > { %v1535_v11 = vadd.f32 %v1152_v9, %v302_v10  ;;  %v1208_v12 = vpop.f32.mrb[1].mxu0  ;;  %v988_v9 = vld [vmem:[%s1656_s3] sm:$0xff]  ;;  %v989_v10 = vld [vmem:[%s1656_s3 + $0x8] sm:$0xff] }
  0xef   : > { %v990_v12 = vld [vmem:[%s1656_s3 + $0x10] sm:$0xff] }
  0xf0   : > { %397 = vrot.lane.b32.xlu1 %v1535_v11, %s1411_s26  ;;  %308 = vrot.lane.b32.xlu0 %v1535_v11, %s1412_s30  ;;  %v306_v13 = vmul.f32 0.17677669, %v1535_v11 }
  0xf4   : > { %476 = vrot.lane.b32.xlu1 %v1535_v11, %s1413_s6 }
  0xf8   : > { %474 = vrot.lane.b32.xlu1 %v306_v13, %s1414_s7  ;;  %s1422_s7 = smov 8  }
  0xfc   : > { %647 = vrot.lane.b32.xlu1 %v1535_v11, %s1415_s8  ;;  %s1423_s8 = smov 16  }
 0x162   : > { %v398_v14 = vpop.permute.xlu1 %397  ;;  %v309_v15 = vpop.permute.xlu0 %308 }
 0x163   : > { %1210 = vmatpush3.xpose.msk.msra.mxu1 %vm310_vm2, %v309_v15 }
 0x164   : > { %1214 = vmatprep.subr.mxu1 %v1410_v6 }
 0x166   : > { %v477_v16 = vpop.permute.xlu1 %476  ;;  %1212 = vmatmul.mubr.msk.f32.vlgmr.msra.gmra.mrb[0].mxu1 %vm310_vm2, %v306_v13 }
 0x167   : > { %1215 = vmatpush3.msra.mxu1 %v398_v14  ;;  %1216 = vmatprep.mubr.msk.f32.mxu1 %vm1409_vm0, %v1410_v6 }
 0x168   : > { %1219 = vmatprep.subr.mxu1 %v1410_v6 }
 0x16a   : > { %v475_v17 = vpop.permute.xlu1 %474 }
 0x16e   : > { %v648_v18 = vpop.permute.xlu1 %647 }
 0x16f   : > { %1230 = vmatpush3.xpose.msk.msra.mxu0 %vm310_vm2, %v648_v18 }
 0x170   : > { %1239 = vmatprep.subr.mxu0 %v1410_v6 }
 0x239   : > { %v382_v19 = vpop.f32.mrb[0].mxu1 }
 0x23a   : > { %v1213_v20 = vpop.f32.mrb[1].mxu1  ;;  %v386_v21 = vsel %vm310_vm2, %v382_v19, -inf }
 0x23b   : > { %387 = vmax.xlane.f32.xlu0 %v386_v21 }
 0x251   : > { %818 = vrot.lane.b32.xlu0 %v1535_v11, %s1416_s9  ;;  %s1424_s9 = smov 24  }
 0x2c8   : > { %v388_v22 = vpop.xlane.xlu0 %387 }
 0x2c9   : > { %v389_v23 = vsub.f32 %v382_v19, %v388_v22 }
 0x2cb   : > { %v390_v24 = vmul.f32 1.442695, %v389_v23  ;;  %v1166_v23 = vld [vmem:[%s1657_s4] ss:$0 sm:$0xff] }
 0x2cc   : > { %v819_v29 = vpop.permute.xlu0 %818 }
 0x2cd   : > { %1328 = vpow2.f32 %v390_v24 }
 0x2d7   : > { %v1329_v25 = vpop.eup %1328 }
 0x2d8   : > { %v392_v26 = vsel %vm310_vm2, %v1329_v25, 0.0 }
 0x2d9   : > { %393 = vadd.xlane.f32.xlu1 %v392_v26 }
 0x2ea   : > { %645 = vrot.lane.b32.xlu1 %v306_v13, %s1417_s10  ;;  %s213_s10 = sand.u32 1, %s1398_s19  }
 0x2eb   : > { %s1074_s26 = scalar_lea.sflag [#allocation4], %s213_s10 }
 0x2ee   : > { %816 = vrot.lane.b32.xlu1 %v306_v13, %s1418_s11  ;;  %s1150_s11 = sshll.u32 %s213_s10, 3 }
 0x2ef   : > { %s215_s15 = scalar_lea.vmem [#allocation3], %s1150_s11 }
 0x2f0   : > { %s1087_s16 = sshll.u32 %s215_s15, 4  ;;  %s1612_s16 = int_to_ptr.vmem [resolvable:$true] %s1087_s16 }
 0x2f1   : > { %s1344_s30 = scalar_lea.vmem %s1612_s16, 128 }
 0x2f2   : > { %p1345_p11 = scmp.ne.s32.totalorder %s1612_s16, %s1344_s30 }
 0x2f4   : > { %p1346_p12 = pnand %p1345_p11, %p1494_p5 }
 0x2f6   : > { %p1347_p13 = pneg %p1346_p12 }
 0x366   : > { %v394_v27 = vpop.xlane.xlu1 %393 }
 0x367   : > { %1330 = vrcp.f32 %v394_v27 }
 0x36a   : > { %v646_v28 = vpop.permute.xlu1 %645 }
 0x36b   : > { %1232 = vmatmul.mubr.msk.f32.vlgmr.msra.gmra.mrb[2].mxu0 %vm310_vm2, %v646_v28 }
 0x36c   : > { %1240 = vmatpush3.xpose.msk.msra.mxu0 %vm310_vm2, %v819_v29  ;;  %1241 = vmatprep.mubr.msk.f32.mxu0 %vm1409_vm0, %v1410_v6 }
 0x36d   : > { %1266 = vmatprep.subr.bf16.mxu0 %v1408_v3 }
 0x36e   : > { %v817_v30 = vpop.permute.xlu1 %816 }
 0x36f   : > { %1242 = vmatmul.mubr.msk.f32.vlgmr.msra.gmra.mrb[4].mxu0 %vm310_vm2, %v817_v30 }
 0x370   : > { %1257 = vmatprep.mubr.msk.f32.mxu0 %vm1409_vm0, %v1410_v6 }
 0x371   : > { %v1331_v31 = vpop.eup %1330 }
 0x372   : > { %v396_v32 = vmul.f32 %v1331_v31, %v1329_v25 }
 0x374   : > { %1217 = vmatmul.mubr.msk.f32.vlgmr.msra.gmra.mrb[2].mxu1 %vm310_vm2, %v396_v32 }
 0x375   : > { %1220 = vmatpush3.xpose.msk.msra.mxu1 %vm310_vm2, %v477_v16  ;;  %1221 = vmatprep.mubr.msk.f32.mxu1 %vm1409_vm0, %v1410_v6 }
 0x376   : > { %1224 = vmatprep.subr.mxu1 %v1410_v6 }
 0x378   : > { %1222 = vmatmul.mubr.msk.f32.vlgmr.msra.gmra.mrb[4].mxu1 %vm310_vm2, %v475_v17 }
 0x379   : > { %1226 = vmatprep.mubr.msk.f32.mxu1 %vm1409_vm0, %v1410_v6 }
 0x43e   : > { %v719_v33 = vpop.f32.mrb[2].mxu0 }
 0x43f   : > { %v1233_v34 = vpop.f32.mrb[3].mxu0  ;;  %v723_v35 = vsel %vm310_vm2, %v719_v33, -inf }
 0x440   : > { %724 = vmax.xlane.f32.xlu0 %v723_v35 }
 0x442   : > { %v890_v36 = vpop.f32.mrb[4].mxu0 }
 0x443   : > { %v1243_v37 = vpop.f32.mrb[5].mxu0  ;;  %v894_v43 = vsel %vm310_vm2, %v890_v36, -inf }
 0x447   : > { %v469_v38 = vpop.f32.mrb[2].mxu1 }
 0x448   : > { %473 = vst.msk [vmem:[#allocation2] sm:$0xff] %vm310_vm2, %v469_v38  ;;  %v1218_v39 = vpop.f32.mrb[3].mxu1 }
 0x44b   : > { %v548_v40 = vpop.f32.mrb[4].mxu1 }
 0x44c   : > { %v1223_v41 = vpop.f32.mrb[5].mxu1  ;;  %v552_v42 = vsel %vm310_vm2, %v548_v40, -inf }
 0x44d   : > { %553 = vmax.xlane.f32.xlu1 %v552_v42 }
 0x451   : > { %895 = vmax.xlane.f32.xlu1 %v894_v43 }
 0x4cd   : > { %v725_v44 = vpop.xlane.xlu0 %724 }
 0x4ce   : > { %v726_v45 = vsub.f32 %v719_v33, %v725_v44 }
 0x4d0   : > { %v727_v46 = vmul.f32 1.442695, %v726_v45 }
 0x4d2   : > { %1332 = vpow2.f32 %v727_v46 }
 0x4da   : > { %v554_v47 = vpop.xlane.xlu1 %553 }
 0x4db   : > { %v555_v55 = vsub.f32 %v548_v40, %v554_v47 }
 0x4dc   : > { %v1333_v48 = vpop.eup %1332 }
 0x4dd   : > { %v729_v49 = vsel %vm310_vm2, %v1333_v48, 0.0  ;;  %v556_v56 = vmul.f32 1.442695, %v555_v55 }
 0x4de   : > { %730 = vadd.xlane.f32.xlu1 %v729_v49  ;;  %v896_v50 = vpop.xlane.xlu1 %895 }
 0x4df   : > { %v897_v51 = vsub.f32 %v890_v36, %v896_v50 }
 0x4e1   : > { %v898_v52 = vmul.f32 1.442695, %v897_v51 }
 0x4e3   : > { %1334 = vpow2.f32 %v898_v52 }
 0x4e4   : > { %1336 = vpow2.f32 %v556_v56 }
 0x4ed   : > { %v1335_v53 = vpop.eup %1334 }
 0x4ee   : > { %v900_v54 = vsel %vm310_vm2, %v1335_v53, 0.0  ;;  %v1337_v57 = vpop.eup %1336 }
 0x4ef   : > { %563 = vrot.lane.b32.xlu1 %v1535_v11, %s1419_s12  ;;  %901 = vadd.xlane.f32.xlu0 %v900_v54  ;;  %v558_v58 = vsel %vm310_vm2, %v1337_v57, 0.0 }
 0x505   : > { %734 = vrot.lane.b32.xlu0 %v1535_v11, %s1420_s13 }
 0x513   : > { %559 = vadd.xlane.f32.xlu1 %v558_v58 }
 0x524   : > { %905 = vrot.lane.b32.xlu1 %v1535_v11, %s1421_s14  ;;  %v1267_v11 = vpack.c.bf16 %v989_v10, %v988_v9  ;;  %s1169_s14 = sshll.u32 %s1477_s22, 7  ;;  %s1425_s22 = smov [#allocation3]  }
 0x525   : > { %s1610_s25 = scalar_lea.hbm %s1658_s5, %s1169_s14  ;;  %s1348_s6 = sshll.u32 %s1425_s22, 4  ;;  %s1349_s6 = int_to_ptr.vmem [resolvable:$false] %s1348_s6 }
 0x526   : > { %1268 = vmatpush3.bf16.msra.mxu0 %v1267_v11  ;;  %p1351_p0 = scmp.lt.s32.totalorder %s1612_s16, %s1349_s6 }
 0x527   : > { %1269 = vmatprep.subr.bf16.mxu0 %v1408_v3 }
 0x56b   : > { %v731_v59 = vpop.xlane.xlu1 %730 }
 0x56f   : > { %v564_v60 = vpop.permute.xlu1 %563 }
 0x570   : > { %1225 = vmatpush3.msra.mxu1 %v564_v60 }
 0x571   : > { %1234 = vmatprep.subr.mxu1 %v1410_v6 }
 0x57c   : > { %v902_v62 = vpop.xlane.xlu0 %901 }
 0x580   : > { %v735_v2 = vpop.permute.xlu0 %734 }
 0x5a0   : > { %v560_v61 = vpop.xlane.xlu1 %559 }
 0x5a1   : > { %1338 = vrcp.f32 %v560_v61 }
 0x5a2   : > { %1340 = vrcp.f32 %v731_v59 }
 0x5a3   : > { %1342 = vrcp.f32 %v902_v62 }
 0x5a4   : > { %v906_v7 = vpop.permute.xlu1 %905 }
 0x5ab   : > { %v1339_v63 = vpop.eup %1338 }
 0x5ac   : > { %v562_v0 = vmul.f32 %v1339_v63, %v1337_v57  ;;  %v1341_v1 = vpop.eup %1340 }
 0x5ad   : > { %v733_v4 = vmul.f32 %v1341_v1, %v1333_v48  ;;  %v1343_v5 = vpop.eup %1342 }
 0x5ae   : > { %1227 = vmatmul.mubr.msk.f32.vlgmr.msra.gmra.mrb[6].mxu1 %vm310_vm2, %v562_v0  ;;  %v904_v8 = vmul.f32 %v1343_v5, %v1335_v53 }
 0x5af   : > { %1235 = vmatpush3.msra.mxu1 %v735_v2  ;;  %1236 = vmatprep.mubr.msk.f32.mxu1 %vm1409_vm0, %v1410_v6 }
 0x5b0   : > { %1244 = vmatprep.subr.mxu1 %v1410_v6 }
 0x5b2   : > { %1237 = vmatmul.mubr.msk.f32.vlgmr.msra.gmra.mrb[8].mxu1 %vm310_vm2, %v733_v4 }
 0x5b3   : > { %1245 = vmatpush3.msra.mxu1 %v906_v7  ;;  %1246 = vmatprep.mubr.msk.f32.mxu1 %vm1409_vm0, %v1410_v6  ;;  %v991_v6 = vld [vmem:[%s1656_s3 + $0x18] sm:$0xff] }
 0x5b4   : > { %v1270_v13 = vpack.c.bf16 %v991_v6, %v990_v12 }
 0x5b6   : > { %1247 = vmatmul.mubr.msk.f32.vlgmr.msra.gmra.mrb[10].mxu1 %vm310_vm2, %v904_v8  ;;  %1271 = vmatpush3.bf16.msra.mxu0 %v1270_v13 }
 0x681   : > { %v635_v14 = vpop.f32.mrb[6].mxu1 }
 0x682   : > { %640 = vrot.lane.b32.xlu1 %v635_v14, %s1422_s7  ;;  %v1228_v15 = vpop.f32.mrb[7].mxu1  ;;  %s1350_s7 = scalar_lea.vmem %s1349_s6, 256 }
 0x683   : > { %p1352_p1 = scmp.lt.s32.totalorder %s1350_s7, %s1344_s30 }
 0x685   : > { %v806_v16 = vpop.f32.mrb[8].mxu1  ;;  %p1353_p2 = por %p1352_p1, %p1351_p0 }
 0x686   : > { %811 = vrot.lane.b32.xlu0 %v806_v16, %s1423_s8  ;;  %v1238_v17 = vpop.f32.mrb[9].mxu1 }
 0x687   : > { %p1354_p3 = pnand %p1353_p2, %p1347_p13 }
 0x689   : > { %v977_v18 = vpop.f32.mrb[10].mxu1 }
 0x68a   : > { %982 = vrot.lane.b32.xlu1 %v977_v18, %s1424_s9  ;;  %v1248_v19 = vpop.f32.mrb[11].mxu1 }
 0x6f4   : > { %v641_v20 = vpop.permute.xlu1 %640 }
 0x6f5   : > { %644 = vst.msk [vmem:[#allocation2] sm:$0xff] %vm643_vm3, %v641_v20 }
 0x6f8   : > { %v812_v3 = vpop.permute.xlu0 %811 }
 0x6f9   : > { %815 = vst.msk [vmem:[#allocation2] sm:$0xff] %vm814_vm4, %v812_v3 }
 0x6fc   : > { %v983_v21 = vpop.permute.xlu1 %982 }
 0x6fd   : > { %986 = vst.msk [vmem:[#allocation2] sm:$0xff] %vm985_vm5, %v983_v21 }
 0x704   : > { %v987_v22 = vld [vmem:[#allocation2] sm:$0xff] }
 0x705   : > { %1258 = vmatmul.mubr.msk.f32.vlgmr.msra.gmra.mrb[6].mxu0 %vm232_vm1, %v987_v22 }
 0x7d8   : > { %v1068_v24 = vpop.f32.mrb[6].mxu0 }
 0x7d9   : > { %v1069_v25 = vadd.f32 %v1166_v23, %v1068_v24  ;;  %v1259_v26 = vpop.f32.mrb[7].mxu0 }
 0x7db   : > { %1072 = vst.msk [vmem:[%s215_s15] sm:$0xff] %vm232_vm1, %v1069_v25 }
 0x7dc   : > { %1357 = shalt.err (!%p1354_p3)
}
 0x7dd   : > { %s1358_s8 = scalar_lea.hbm %s1610_s25, 128  ;;  %s1362_s11 = scalar_lea.hbm %s1658_s5, 256 }
 0x7de   : > { %p1359_p4 = scmp.ne.s32.totalorder %s1610_s25, %s1358_s8  ;;  %p1363_p9 = scmp.lt.u32.totalorder %s1610_s25, %s1658_s5 }
 0x7df   : > { %p1364_p10 = scmp.lt.u32.totalorder %s1362_s11, %s1358_s8  ;;  %p1366_p12 = scmp.lt.u32.totalorder %s1358_s8, %s1610_s25 }
 0x7e0   : > { %p1360_p7 = pnand %p1359_p4, %p1494_p5 }
 0x7e1   : > { %p1365_p11 = por %p1364_p10, %p1363_p9 }
 0x7e2   : > { %p1361_p8 = pneg %p1360_p7 }
 0x7e3   : > { %p1367_p13 = por %p1366_p12, %p1365_p11 }
 0x7e5   : > { %p1368_p0 = pnand %p1367_p13, %p1361_p8 }
 0x7e7   : > { %1371 = shalt.err (!%p1368_p0)
}
 0x7e8   : > { %1272 = dma.vmem_to_hbm [thread:$0]  (%p1494_p5), %s1612_s16, 128, %s1610_s25, %s1074_s26  }
 0x7e9 PF: > { %p1278_p1 = scmp.ge.s32.totalorder %s1406_s21, 2  ;;  %s1099_s14 = sand.u32 1, %s1394_s18  }
 0x7ea   : > { %s1100_s15 = scalar_lea.sflag [#allocation4], %s1099_s14 }
 0x7eb   : > { %p1275_p2 = pnand %p1278_p1, %p1498_p6 }
 0x7ed   : > { %1389 = dma.done.wait (!%p1275_p2), %s1100_s15, 128  }
 0x7ee   : > { %1391 = vsyncadd (!%p1275_p2), %s1100_s15, 4294967168  ;;  %p15_p3 = scmp.ge.s32.totalorder %s1481_s24, 4   ;;  %s1661_s18 = smov %s1398_s19 }
 0x7ef   : > { %s1662_s19 = smov %s1402_s20  ;;  %s1663_s20 = smov %s1492_s27 }
 0x7f0   : > { %s1664_s21 = smov %s1481_s24  ;;  %17 = sbr.rel (!%p15_p3) target bundleno = 3 (0x3), region = 75 }
 0x7f7   :  { %1105 = vsyncpa [#allocation4], 1 }
 0x7f8   :  { %1107 = vsyncpa [#allocation4 + $0x1], 1 }

</bundles_post_ra>
